<compile_context>
chip_gen: v7x
topology: tpu7x:2x2x1
jax: 0.10.0
libtpu: 0.0.40
codegen_flags: <defaults>
</compile_context>

<pallas_src>
import functools
from collections import namedtuple

import jax
import jax.numpy as jnp
import numpy as np
from jax.experimental import pallas as pl
from jax.experimental.pallas import tpu as pltpu

GraphsTuple = namedtuple(
    "GraphsTuple",
    ["nodes", "edges", "receivers", "senders", "globals", "n_node", "n_edge"])


def _agg_kernel(idx_ref, edges_ref, out_ref, *scratch, edge_tile, node_tile):
  """Grid = (node_blocks [parallel], edge_tiles [arbitrary reduction])."""
  nb = pl.program_id(0)            # node-block index
  k = pl.program_id(1)             # edge-tile index (reduction axis)
  # For f32 outputs accumulate directly into the resident output block.
  acc_ref = scratch[0] if scratch else out_ref

  @pl.when(k == 0)
  def _():
    acc_ref[...] = jnp.zeros_like(acc_ref)

  # Whole index slab is resident in VMEM; slice this edge tile's row -> (1, te).
  idx = idx_ref[pl.ds(k, 1), :]

  # one_hot[t, e] = (indices[e] == nb * node_tile + t), built in the edges
  # dtype (exact for 0/1) so bf16 inputs stay on the fast MXU path.
  node_ids = nb * node_tile + jax.lax.broadcasted_iota(
      jnp.int32, (node_tile, edge_tile), 0)
  one_hot = (idx == node_ids).astype(edges_ref.dtype)      # (tn, te)

  # (tn, te) @ (te, D_pad) -> (tn, D_pad) on the MXU, f32 accumulation.
  acc_ref[...] += jnp.dot(one_hot, edges_ref[...],
                          preferred_element_type=jnp.float32)

  if scratch:
    @pl.when(k == pl.num_programs(1) - 1)
    def _():
      out_ref[...] = acc_ref[...].astype(out_ref.dtype)


def edges_to_nodes_sum(edges, indices, num_nodes, *,
                       edge_tile=256, node_tile=128):
  """Pallas scatter-add: out[n] = sum_{indices[e] == n} edges[e]."""
  E, D = edges.shape
  out_dtype = edges.dtype

  # Lane-dense feature dim (multiple of 128); padded cols sliced off at the end.
  D_pad = pl.cdiv(D, 128) * 128
  # Pad edge count to a multiple of edge_tile; padded rows get index -1 so
  # their one-hot row is all-zero (no spurious contribution to node 0).
  E_pad = pl.cdiv(E, edge_tile) * edge_tile
  # Pad node count to a multiple of node_tile; extra rows sliced off at the end.
  N_pad = pl.cdiv(num_nodes, node_tile) * node_tile

  edges_p = jnp.zeros((E_pad, D_pad), dtype=edges.dtype).at[:E, :D].set(edges)
  idx_p = jnp.full((E_pad,), -1, dtype=jnp.int32).at[:E].set(
      indices.astype(jnp.int32))
  num_edge_tiles = E_pad // edge_tile
  idx_p = idx_p.reshape(num_edge_tiles, edge_tile)   # lane-dense index slab

  num_node_blocks = N_pad // node_tile
  use_scratch = out_dtype != jnp.float32             # f32 accumulates in-place

  kernel = functools.partial(
      _agg_kernel, edge_tile=edge_tile, node_tile=node_tile)

  # TODO(synk): for large sorted-by-node edge lists, a scalar-prefetch variant
  # (per-edge-tile node-block ids) could skip node blocks an edge tile never
  # touches, removing the one-hot FLOP waste inherent to this formulation.
  out = pl.pallas_call(
      kernel,
      out_shape=jax.ShapeDtypeStruct((N_pad, D_pad), out_dtype),
      grid_spec=pltpu.PrefetchScalarGridSpec(
          num_scalar_prefetch=0,
          grid=(num_node_blocks, num_edge_tiles),
          in_specs=[
              # Full index slab, resident in VMEM across the whole grid
              # (constant block index) -> no tiny per-step index DMAs.
              pl.BlockSpec((num_edge_tiles, edge_tile), lambda n, k: (0, 0)),
              pl.BlockSpec((edge_tile, D_pad), lambda n, k: (k, 0)),
          ],
          out_specs=pl.BlockSpec((node_tile, D_pad), lambda n, k: (n, 0)),
          scratch_shapes=(
              [pltpu.VMEM((node_tile, D_pad), jnp.float32)]
              if use_scratch else []),
      ),
      compiler_params=pltpu.CompilerParams(
          dimension_semantics=("parallel", "arbitrary"),
          vmem_limit_bytes=32 * 1024 * 1024),
  )(idx_p, edges_p)

  return out[:num_nodes, :D]


class EdgesToNodesAggregator:
  """JAX/Pallas port of _EdgesToNodesAggregator (reducer = scatter-add)."""

  def __init__(self, use_sent_edges=False):
    self._use_sent_edges = use_sent_edges

  def __call__(self, graph):
    for field in ("edges", "senders", "receivers"):
      if getattr(graph, field) is None:
        raise ValueError(
            "`{}` field cannot be None when aggregating from edges.".format(field))
    # num_nodes sizes the output, so it must be concrete (mirrors
    # torch.sum(graph.n_node) used as dim_size); do not call under jit with a
    # traced n_node.
    num_nodes = int(jnp.sum(graph.n_node))
    indices = graph.senders if self._use_sent_edges else graph.receivers
    return edges_to_nodes_sum(graph.edges, indices, num_nodes)


if __name__ == "__main__":
  key = jax.random.PRNGKey(0)
  k_edges, k_recv, k_send = jax.random.split(key, 3)

  # Small synthetic graph batch: 2 graphs, 16 nodes total, 128 edges, D=32.
  n_node = jnp.array([10, 6], dtype=jnp.int32)        # sum = 16 nodes
  n_edge = jnp.array([80, 48], dtype=jnp.int32)       # sum = 128 edges
  num_nodes = int(jnp.sum(n_node))
  num_edges = int(jnp.sum(n_edge))
  D = 32

  edges = jax.random.normal(k_edges, (num_edges, D), dtype=jnp.float32)
  receivers = jax.random.randint(k_recv, (num_edges,), 0, num_nodes,
                                 dtype=jnp.int32)
  senders = jax.random.randint(k_send, (num_edges,), 0, num_nodes,
                               dtype=jnp.int32)

  graph = GraphsTuple(nodes=None, edges=edges, receivers=receivers,
                      senders=senders, globals=None, n_node=n_node,
                      n_edge=n_edge)

  # receivers path (f32 output -> accumulates directly in the output block).
  agg = EdgesToNodesAggregator(use_sent_edges=False)
  out = jax.block_until_ready(agg(graph))
  ref = jax.ops.segment_sum(edges, receivers, num_segments=num_nodes)
  np.testing.assert_allclose(np.asarray(out), np.asarray(ref),
                             rtol=1e-5, atol=1e-5)

  # senders path.
  agg_s = EdgesToNodesAggregator(use_sent_edges=True)
  out_s = jax.block_until_ready(agg_s(graph))
  ref_s = jax.ops.segment_sum(edges, senders, num_segments=num_nodes)
  np.testing.assert_allclose(np.asarray(out_s), np.asarray(ref_s),
                             rtol=1e-5, atol=1e-5)

  # bf16 edges exercise the bf16 MXU inputs + f32-scratch accumulator path.
  graph_b = graph._replace(edges=edges.astype(jnp.bfloat16))
  out_b = jax.block_until_ready(EdgesToNodesAggregator(False)(graph_b))
  ref_b = jax.ops.segment_sum(
      edges.astype(jnp.bfloat16).astype(jnp.float32), receivers,
      num_segments=num_nodes).astype(jnp.bfloat16)
  np.testing.assert_allclose(np.asarray(out_b.astype(jnp.float32)),
                             np.asarray(ref_b.astype(jnp.float32)),
                             rtol=5e-2, atol=5e-2)

  print("KERNEL_OK")
</pallas_src>

<mosaic_0001>
module attributes {stable_mosaic.version = 11 : i64} {
  func.func @_agg_kernel(%arg0: i32, %arg1: i32, %arg2: memref<1x256xi32, #tpu.memory_space<vmem>>, %arg3: memref<256x128xf32, #tpu.memory_space<vmem>>, %arg4: memref<128x128xf32, #tpu.memory_space<vmem>>) attributes {dimension_semantics = [#tpu.dimension_semantics<parallel>, #tpu.dimension_semantics<arbitrary>], iteration_bounds = array<i64: 1, 1>, scalar_prefetch = 0 : i64, scratch_operands = 0 : i64, tpu.core_type = #tpu.core_type<tc>, window_params = [{pipeline_mode = #tpu.pipeline_mode<synchronous>, transform_indices = @transform_0, window_bounds = array<i64: 1, 256>}, {transform_indices = @transform_1, window_bounds = array<i64: 256, 128>}, {transform_indices = @transform_2, window_bounds = array<i64: 128, 128>}]} {
    %c0_i32 = arith.constant 0 : i32
    %0 = arith.cmpi eq, %arg1, %c0_i32 : i32
    %1 = arith.extui %0 : i1 to i32
    %c0_i32_0 = arith.constant 0 : i32
    %2 = arith.cmpi ne, %1, %c0_i32_0 : i32
    scf.if %2 {
      %cst_7 = arith.constant 0.000000e+00 : f32
      %18 = vector.broadcast %cst_7 : f32 to vector<128x128xf32>
      %c0_8 = arith.constant 0 : index
      %c0_9 = arith.constant 0 : index
      %19 = vector.load %arg4[%c0_8, %c0_9] : memref<128x128xf32, #tpu.memory_space<vmem>>, vector<128x128xf32>
      tpu.vector_store %arg4[%c0_8, %c0_9], %18 {strides = array<i32>} : memref<128x128xf32, #tpu.memory_space<vmem>>, vector<128x128xf32>,
    } else {
    }
    %3 = arith.index_cast %arg1 : i32 to index
    %c0 = arith.constant 0 : index
    %4 = vector.load %arg2[%3, %c0] : memref<1x256xi32, #tpu.memory_space<vmem>>, vector<1x256xi32>
    %c128_i32 = arith.constant 128 : i32
    %5 = arith.muli %arg0, %c128_i32 : i32
    %6 = tpu.iota {dimensions = array<i32: 0>} : vector<128x256xi32>
    %7 = vector.broadcast %5 : i32 to vector<128x256xi32>
    %8 = arith.addi %7, %6 : vector<128x256xi32>
    %9 = vector.broadcast %4 : vector<1x256xi32> to vector<128x256xi32>
    %10 = arith.cmpi eq, %9, %8 : vector<128x256xi32>
    %11 = arith.extui %10 : vector<128x256xi1> to vector<128x256xi32>
    %12 = arith.sitofp %11 : vector<128x256xi32> to vector<128x256xf32>
    %c0_1 = arith.constant 0 : index
    %c0_2 = arith.constant 0 : index
    %13 = vector.load %arg4[%c0_1, %c0_2] : memref<128x128xf32, #tpu.memory_space<vmem>>, vector<128x128xf32>
    %c0_3 = arith.constant 0 : index
    %c0_4 = arith.constant 0 : index
    %14 = vector.load %arg3[%c0_3, %c0_4] : memref<256x128xf32, #tpu.memory_space<vmem>>, vector<256x128xf32>
    %cst = arith.constant dense<0.000000e+00> : vector<128x128xf32>
    %15 = tpu.matmul %12, %14, %cst {dimension_numbers = #tpu.dot_dimension_numbers<[1], [0], [0], [1], [0, 0, 1, 1], [], []>} : vector<128x256xf32>, vector<256x128xf32>, vector<128x128xf32> -> vector<128x128xf32>
    %16 = arith.addf %13, %15 : vector<128x128xf32>
    %c0_5 = arith.constant 0 : index
    %c0_6 = arith.constant 0 : index
    %17 = vector.load %arg4[%c0_5, %c0_6] : memref<128x128xf32, #tpu.memory_space<vmem>>, vector<128x128xf32>
    tpu.vector_store %arg4[%c0_5, %c0_6], %16 {strides = array<i32>} : memref<128x128xf32, #tpu.memory_space<vmem>>, vector<128x128xf32>,
    return
  }
  func.func @transform_0(%arg0: i32, %arg1: i32) -> (i32, i32) {
    %c0_i32 = arith.constant 0 : i32
    %c0_i32_0 = arith.constant 0 : i32
    %c0_i32_1 = arith.constant 0 : i32
    return %c0_i32, %c0_i32_0 : i32, i32
  }
  func.func @transform_1(%arg0: i32, %arg1: i32) -> (i32, i32) {
    %c0_i32 = arith.constant 0 : i32
    %c0_i32_0 = arith.constant 0 : i32
    return %arg1, %c0_i32 : i32, i32
  }
  func.func @transform_2(%arg0: i32, %arg1: i32) -> (i32, i32) {
    %c0_i32 = arith.constant 0 : i32
    %c0_i32_0 = arith.constant 0 : i32
    return %arg0, %c0_i32 : i32, i32
  }
}

</mosaic_0001>

<bundles_post_ra>
// kernel: tpu_custom_call.1
= control target key start
LH: loop header
LB: loop body
LE: loop exit
PB: predicated region body
PF: predicated region fallthrough
CT: control target
= control target key end

     0   :  { %7 = vsyncpa [#allocation3], 0  ;;  %s877_s0 = inlined_call_operand.hbm [shape: s32[1,256], index: 0, kind: input, shape index: {}]   ;;  %s878_s1 = inlined_call_operand.hbm [shape: f32[256,128], index: 1, kind: input, shape index: {}]   ;;  %s879_s2 = inlined_call_operand.hbm [shape: f32[128,128], index: 2, kind: output, shape index: {}]  }
   0x1   :  { %8 = vsyncpa [#allocation6], 0 }
   0x2   :  { %9 = vsyncpa [#allocation4], 0  ;;  %s714_s9 = smov [#allocation2]   ;;  %s715_s11 = smov [#allocation5]  }
   0x3   :  { %s16_s10 = sshll.u32 %s714_s9, 4  ;;  %s25_s12 = sshll.u32 %s715_s11, 4  ;;  %s17_s10 = int_to_ptr.vmem [resolvable:$true] %s16_s10  ;;  %s735_s12 = int_to_ptr.vmem [resolvable:$true] %s25_s12 }
   0x4   :  { %s642_s15 = scalar_lea.hbm %s877_s0, 32 }
   0x5   :  { %p643_p0 = scmp.ne.s32.totalorder %s877_s0, %s642_s15  ;;  %p646_p1 = scmp.lt.u32.totalorder %s642_s15, %s877_s0 }
   0x7   :  { %p648_p2 = pnand %p646_p1, %p643_p0 }
   0x9   :  { %651 = shalt.err (!%p648_p2)
}
   0xa   :  { %s652_s20 = scalar_lea.vmem %s17_s10, 32  ;;  %p657_p4 = scmp.lt.s32.totalorder %s17_s10, %s17_s10 }
   0xb   :  { %p653_p3 = scmp.ne.s32.totalorder %s17_s10, %s652_s20  ;;  %p658_p5 = scmp.lt.s32.totalorder %s652_s20, %s652_s20 }
   0xd   :  { %p659_p6 = por %p658_p5, %p657_p4 }
   0xf   :  { %p660_p7 = pnand %p659_p6, %p653_p3 }
  0x11   :  { %663 = shalt.err (!%p660_p7)
}
  0x12   :  { %19 = dma.hbm_to_vmem [thread:$0]  %s877_s0, 32, %s17_s10, [#allocation3]  }
  0x13   :  { %s664_s25 = scalar_lea.hbm %s878_s1, 4096 }
  0x14   :  { %p665_p8 = scmp.ne.s32.totalorder %s878_s1, %s664_s25  ;;  %p668_p9 = scmp.lt.u32.totalorder %s664_s25, %s878_s1 }
  0x16   :  { %p670_p10 = pnand %p668_p9, %p665_p8 }
  0x18   :  { %673 = shalt.err (!%p670_p10)
}
  0x19   :  { %s674_s30 = scalar_lea.vmem %s735_s12, 4096  ;;  %p679_p12 = scmp.lt.s32.totalorder %s735_s12, %s735_s12 }
  0x1a   :  { %p675_p11 = scmp.ne.s32.totalorder %s735_s12, %s674_s30  ;;  %p680_p13 = scmp.lt.s32.totalorder %s674_s30, %s674_s30 }
  0x1c   :  { %p681_p0 = por %p680_p13, %p679_p12 }
  0x1e   :  { %p682_p1 = pnand %p681_p0, %p675_p11 }
  0x20   :  { %685 = shalt.err (!%p682_p1)
}
  0x21   :  { %s716_s0 = smov 128   ;;  %s717_s3 = smov 8  }
  0x22   :  { %31 = dma.hbm_to_vmem [thread:$0]  %s878_s1, 4096, %s735_s12, [#allocation6], %s716_s0, %s716_s0, %s717_s3  }
  0x23   :  { %708 = dma.done.wait [#allocation3], 32  }
  0x24   :  { %709 = vsyncadd [#allocation3], 4294967264 }
  0x25   :  { %710 = dma.done.wait [#allocation6], 4096  }
  0x26   :  { %711 = vsyncadd [#allocation6], 4294963200  ;;  %v62_v0 = vlaneseq  ;;  %v232_v1 = vld [vmem:[#allocation5 + $0x80] sm:$0xff]  ;;  %v233_v2 = vld [vmem:[#allocation5 + $0x88] sm:$0xff]  ;;  %v718_v37 = vmov 1.0   ;;  %s719_s1 = smov [#allocation7]  }
  0x27   :  { %v216_v3 = vld [vmem:[#allocation5] sm:$0xff]  ;;  %v587_v4 = vpack.c.bf16 %v233_v2, %v232_v1  ;;  %v217_v5 = vld [vmem:[#allocation5 + $0x8] sm:$0xff]  ;;  %v234_v6 = vld [vmem:[#allocation5 + $0x90] sm:$0xff]  ;;  %s430_s6 = sshll.u32 %s719_s1, 4  ;;  %s431_s6 = int_to_ptr.vmem [resolvable:$true] %s430_s6 }
  0x28   :  { %v235_v7 = vld [vmem:[#allocation5 + $0x98] sm:$0xff]  ;;  %v589_v8 = vpack.c.bf16 %v217_v5, %v216_v3  ;;  %v218_v10 = vld [vmem:[#allocation5 + $0x10] sm:$0xff]  ;;  %v236_v12 = vld [vmem:[#allocation5 + $0xa0] sm:$0xff]  ;;  %v769_v14 = vshrl.u32 %v62_v0, 7  ;;  %s686_s7 = scalar_lea.vmem %s431_s6, 2048  ;;  %p691_p3 = scmp.lt.s32.totalorder %s431_s6, %s431_s6 }
  0x29   :  { %v591_v9 = vpack.c.bf16 %v235_v7, %v234_v6  ;;  %v219_v11 = vld [vmem:[#allocation5 + $0x18] sm:$0xff]  ;;  %588 = vmatprep.subr.bf16.mxu0 %v587_v4  ;;  %619 = vmatprep.subr.bf16.mxu1 %v587_v4  ;;  %v237_v13 = vld [vmem:[#allocation5 + $0xa8] sm:$0xff]  ;;  %v220_v17 = vld [vmem:[#allocation5 + $0x20] sm:$0xff]  ;;  %p687_p2 = scmp.ne.s32.totalorder %s431_s6, %s686_s7  ;;  %p692_p4 = scmp.lt.s32.totalorder %s686_s7, %s686_s7 }
  0x2a   :  { %590 = vmatpush3.bf16.msra.mxu0 %v589_v8  ;;  %627 = vmatpush3.bf16.msra.mxu1 %v589_v8  ;;  %v593_v15 = vpack.c.bf16 %v219_v11, %v218_v10  ;;  %v595_v16 = vpack.c.bf16 %v237_v13, %v236_v12  ;;  %v221_v18 = vld [vmem:[#allocation5 + $0x28] sm:$0xff]  ;;  %v238_v19 = vld [vmem:[#allocation5 + $0xb0] sm:$0xff]  ;;  %v239_v20 = vld [vmem:[#allocation5 + $0xb8] sm:$0xff]  ;;  %v102_v21 = vsub.s32 1, %v769_v14  ;;  %v773_v26 = vadd.s32 64, %v769_v14 }
  0x2b   :  { %592 = vmatprep.subr.bf16.mxu0 %v591_v9  ;;  %620 = vmatprep.subr.bf16.mxu1 %v591_v9  ;;  %v597_v22 = vpack.c.bf16 %v221_v18, %v220_v17  ;;  %v599_v23 = vpack.c.bf16 %v239_v20, %v238_v19  ;;  %v222_v24 = vld [vmem:[#allocation5 + $0x30] sm:$0xff]  ;;  %v223_v25 = vld [vmem:[#allocation5 + $0x38] sm:$0xff]  ;;  %v240_v27 = vld [vmem:[#allocation5 + $0xc0] sm:$0xff]  ;;  %v98_v51 = vsub.s32 0, %v769_v14  ;;  %v64_v57 = vadd.s32 8, %v769_v14  ;;  %p693_p5 = por %p692_p4, %p691_p3 }
  0x2c   :  { %v241_v28 = vld [vmem:[#allocation5 + $0xc8] sm:$0xff]  ;;  %v60_v29 = vld [vmem:[#allocation2] sm:$0x3]  ;;  %v601_v31 = vpack.c.bf16 %v223_v25, %v222_v24  ;;  %v224_v33 = vld [vmem:[#allocation5 + $0x40] sm:$0xff]  ;;  %v72_v58 = vadd.s32 72, %v769_v14  ;;  %v65_v59 = vadd.s32 16, %v769_v14 }
  0x2d   :  { %v775_v30 = vrot.slane %v60_v29, %v102_v21  ;;  %v603_v32 = vpack.c.bf16 %v241_v28, %v240_v27  ;;  %v225_v34 = vld [vmem:[#allocation5 + $0x48] sm:$0xff]  ;;  %v242_v35 = vld [vmem:[#allocation5 + $0xd0] sm:$0xff]  ;;  %v243_v36 = vld [vmem:[#allocation5 + $0xd8] sm:$0xff]  ;;  %v784_v56 = vrot.slane %v60_v29, %v98_v51  ;;  %v73_v60 = vadd.s32 80, %v769_v14  ;;  %p694_p6 = pnand %p693_p5, %p687_p2 }
  0x2e   :  { %594 = vmatpush3.bf16.msra.mxu0 %v593_v15  ;;  %628 = vmatpush3.bf16.msra.mxu1 %v593_v15  ;;  %v605_v38 = vpack.c.bf16 %v225_v34, %v224_v33  ;;  %v607_v39 = vpack.c.bf16 %v243_v36, %v242_v35  ;;  %v226_v40 = vld [vmem:[#allocation5 + $0x50] sm:$0xff]  ;;  %v227_v41 = vld [vmem:[#allocation5 + $0x58] sm:$0xff]  ;;  %v244_v42 = vld [vmem:[#allocation5 + $0xe0] sm:$0xff]  ;;  %v66_v61 = vadd.s32 24, %v769_v14  ;;  %v74_v62 = vadd.s32 88, %v769_v14 }
  0x2f   :  { %596 = vmatprep.subr.bf16.mxu0 %v595_v16  ;;  %621 = vmatprep.subr.bf16.mxu1 %v595_v16  ;;  %vm105_vm0 = vcmp.eq.s32.totalorder %v775_v30, %v769_v14  ;;  %vm121_vm1 = vcmp.eq.s32.totalorder %v775_v30, %v773_v26  ;;  %v245_v43 = vld [vmem:[#allocation5 + $0xe8] sm:$0xff]  ;;  %v609_v44 = vpack.c.bf16 %v227_v41, %v226_v40  ;;  %v228_v46 = vld [vmem:[#allocation5 + $0x60] sm:$0xff]  ;;  %v246_v48 = vld [vmem:[#allocation5 + $0xf0] sm:$0xff]  ;;  %v67_v63 = vadd.s32 32, %v769_v14 }
  0x30   :  { %475 = vmatprep.mubr.msk.f32.mxu0 %vm105_vm0, %v718_v37  ;;  %491 = vmatprep.mubr.msk.f32.mxu1 %vm121_vm1, %v718_v37  ;;  %v611_v45 = vpack.c.bf16 %v245_v43, %v244_v42  ;;  %v229_v47 = vld [vmem:[#allocation5 + $0x68] sm:$0xff]  ;;  %v247_v49 = vld [vmem:[#allocation5 + $0xf8] sm:$0xff]  ;;  %v230_v53 = vld [vmem:[#allocation5 + $0x70] sm:$0xff]  ;;  %vm104_vm2 = vcmp.eq.s32.totalorder %v784_v56, %v769_v14  ;;  %vm120_vm3 = vcmp.eq.s32.totalorder %v784_v56, %v773_v26  ;;  %v75_v0 = vadd.s32 96, %v769_v14 }
  0x31   :  { %v613_v50 = vpack.c.bf16 %v229_v47, %v228_v46  ;;  %v615_v52 = vpack.c.bf16 %v247_v49, %v246_v48  ;;  %v231_v54 = vld [vmem:[#allocation5 + $0x78] sm:$0xff]  ;;  %vm107_vm4 = vcmp.eq.s32.totalorder %v775_v30, %v64_v57  ;;  %vm123_vm5 = vcmp.eq.s32.totalorder %v775_v30, %v72_v58 }
  0x32   :  { %598 = vmatpush3.bf16.msra.mxu0 %v597_v22  ;;  %629 = vmatpush3.bf16.msra.mxu1 %v597_v22  ;;  %v617_v55 = vpack.c.bf16 %v231_v54, %v230_v53  ;;  %vm106_vm6 = vcmp.eq.s32.totalorder %v784_v56, %v64_v57  ;;  %vm122_vm7 = vcmp.eq.s32.totalorder %v784_v56, %v72_v58  ;;  %v68_v1 = vadd.s32 40, %v769_v14 }
  0x33   :  { %600 = vmatprep.subr.bf16.mxu0 %v599_v23  ;;  %622 = vmatprep.subr.bf16.mxu1 %v599_v23  ;;  %vm109_vm8 = vcmp.eq.s32.totalorder %v775_v30, %v65_v59  ;;  %vm125_vm9 = vcmp.eq.s32.totalorder %v775_v30, %v73_v60  ;;  %vm108_vm10 = vcmp.eq.s32.totalorder %v784_v56, %v65_v59  ;;  %v76_v2 = vadd.s32 104, %v769_v14 }
  0x34   :  { %vm124_vm11 = vcmp.eq.s32.totalorder %v784_v56, %v73_v60  ;;  %vm111_vm12 = vcmp.eq.s32.totalorder %v775_v30, %v66_v61  ;;  %vm127_vm13 = vcmp.eq.s32.totalorder %v775_v30, %v74_v62  ;;  %vm110_vm14 = vcmp.eq.s32.totalorder %v784_v56, %v66_v61 }
  0x35   :  { %vm126_vm15 = vcmp.eq.s32.totalorder %v784_v56, %v74_v62  ;;  %vm113_vm0 = vcmp.eq.s32.totalorder %v775_v30, %v67_v63  ;;  %vm129_vm1 = vcmp.eq.s32.totalorder %v775_v30, %v75_v0  ;;  %v69_v3 = vadd.s32 48, %v769_v14 }
  0x36   :  { %602 = vmatpush3.bf16.msra.mxu0 %v601_v31  ;;  %630 = vmatpush3.bf16.msra.mxu1 %v601_v31  ;;  %v77_v4 = vadd.s32 112, %v769_v14  ;;  %v70_v5 = vadd.s32 56, %v769_v14  ;;  %v78_v6 = vadd.s32 120, %v769_v14 }
  0x37   :  { %604 = vmatprep.subr.bf16.mxu0 %v603_v32  ;;  %623 = vmatprep.subr.bf16.mxu1 %v603_v32 }
  0x3a   :  { %606 = vmatpush3.bf16.msra.mxu0 %v605_v38  ;;  %631 = vmatpush3.bf16.msra.mxu1 %v605_v38 }
  0x3b   :  { %608 = vmatprep.subr.bf16.mxu0 %v607_v39  ;;  %624 = vmatprep.subr.bf16.mxu1 %v607_v39 }
  0x3e   :  { %610 = vmatpush3.bf16.msra.mxu0 %v609_v44  ;;  %632 = vmatpush3.bf16.msra.mxu1 %v609_v44 }
  0x3f   :  { %612 = vmatprep.subr.bf16.mxu0 %v611_v45  ;;  %625 = vmatprep.subr.bf16.mxu1 %v611_v45 }
  0x42   :  { %614 = vmatpush3.bf16.msra.mxu0 %v613_v50  ;;  %633 = vmatpush3.bf16.msra.mxu1 %v613_v50 }
  0x43   :  { %616 = vmatprep.subr.bf16.mxu0 %v615_v52  ;;  %626 = vmatprep.subr.bf16.mxu1 %v615_v52 }
  0x46   :  { %618 = vmatpush3.bf16.msra.mxu0 %v617_v55  ;;  %634 = vmatpush3.bf16.msra.mxu1 %v617_v55 }
  0x49   :  { %476 = vmatmul.mubr.msk.f32.vlgmr.msra.gmra.mrb[0].mxu0 %vm104_vm2, %v718_v37  ;;  %492 = vmatmul.mubr.msk.f32.vlgmr.msra.gmra.mrb[0].mxu1 %vm120_vm3, %v718_v37  ;;  %vm112_vm2 = vcmp.eq.s32.totalorder %v784_v56, %v67_v63  ;;  %vm128_vm3 = vcmp.eq.s32.totalorder %v784_v56, %v75_v0 }
  0x4a   :  { %477 = vmatprep.mubr.msk.f32.mxu0 %vm107_vm4, %v718_v37  ;;  %493 = vmatprep.mubr.msk.f32.mxu1 %vm123_vm5, %v718_v37  ;;  %vm115_vm4 = vcmp.eq.s32.totalorder %v775_v30, %v68_v1  ;;  %vm131_vm5 = vcmp.eq.s32.totalorder %v775_v30, %v76_v2 }
  0x4d   :  { %478 = vmatmul.mubr.msk.f32.gmra.mrb[2].mxu0 %vm106_vm6, %v718_v37  ;;  %494 = vmatmul.mubr.msk.f32.gmra.mrb[2].mxu1 %vm122_vm7, %v718_v37  ;;  %vm114_vm6 = vcmp.eq.s32.totalorder %v784_v56, %v68_v1  ;;  %vm130_vm7 = vcmp.eq.s32.totalorder %v784_v56, %v76_v2 }
  0x4e   :  { %479 = vmatprep.mubr.msk.f32.mxu0 %vm109_vm8, %v718_v37  ;;  %495 = vmatprep.mubr.msk.f32.mxu1 %vm125_vm9, %v718_v37  ;;  %vm117_vm8 = vcmp.eq.s32.totalorder %v775_v30, %v69_v3  ;;  %vm133_vm9 = vcmp.eq.s32.totalorder %v775_v30, %v77_v4 }
  0x51   :  { %480 = vmatmul.mubr.msk.f32.gmra.mrb[4].mxu0 %vm108_vm10, %v718_v37  ;;  %496 = vmatmul.mubr.msk.f32.gmra.mrb[4].mxu1 %vm124_vm11, %v718_v37  ;;  %vm116_vm10 = vcmp.eq.s32.totalorder %v784_v56, %v69_v3  ;;  %vm132_vm11 = vcmp.eq.s32.totalorder %v784_v56, %v77_v4 }
  0x52   :  { %481 = vmatprep.mubr.msk.f32.mxu0 %vm111_vm12, %v718_v37  ;;  %497 = vmatprep.mubr.msk.f32.mxu1 %vm127_vm13, %v718_v37  ;;  %vm119_vm12 = vcmp.eq.s32.totalorder %v775_v30, %v70_v5  ;;  %vm135_vm13 = vcmp.eq.s32.totalorder %v775_v30, %v78_v6 }
  0x55   :  { %482 = vmatmul.mubr.msk.f32.gmra.mrb[6].mxu0 %vm110_vm14, %v718_v37  ;;  %498 = vmatmul.mubr.msk.f32.gmra.mrb[6].mxu1 %vm126_vm15, %v718_v37  ;;  %vm118_vm14 = vcmp.eq.s32.totalorder %v784_v56, %v70_v5  ;;  %vm134_vm15 = vcmp.eq.s32.totalorder %v784_v56, %v78_v6 }
  0x56   :  { %483 = vmatprep.mubr.msk.f32.mxu0 %vm113_vm0, %v718_v37  ;;  %499 = vmatprep.mubr.msk.f32.mxu1 %vm129_vm1, %v718_v37 }
  0x59   :  { %484 = vmatmul.mubr.msk.f32.gmra.mrb[8].mxu0 %vm112_vm2, %v718_v37  ;;  %500 = vmatmul.mubr.msk.f32.gmra.mrb[8].mxu1 %vm128_vm3, %v718_v37 }
  0x5a   :  { %485 = vmatprep.mubr.msk.f32.mxu0 %vm115_vm4, %v718_v37  ;;  %501 = vmatprep.mubr.msk.f32.mxu1 %vm131_vm5, %v718_v37 }
  0x5d   :  { %486 = vmatmul.mubr.msk.f32.gmra.mrb[10].mxu0 %vm114_vm6, %v718_v37  ;;  %502 = vmatmul.mubr.msk.f32.gmra.mrb[10].mxu1 %vm130_vm7, %v718_v37 }
  0x5e   :  { %487 = vmatprep.mubr.msk.f32.mxu0 %vm117_vm8, %v718_v37  ;;  %503 = vmatprep.mubr.msk.f32.mxu1 %vm133_vm9, %v718_v37 }
  0x61   :  { %488 = vmatmul.mubr.msk.f32.gmra.mrb[12].mxu0 %vm116_vm10, %v718_v37  ;;  %504 = vmatmul.mubr.msk.f32.gmra.mrb[12].mxu1 %vm132_vm11, %v718_v37 }
  0x62   :  { %489 = vmatprep.mubr.msk.f32.mxu0 %vm119_vm12, %v718_v37  ;;  %505 = vmatprep.mubr.msk.f32.mxu1 %vm135_vm13, %v718_v37 }
  0x65   :  { %490 = vmatmul.mubr.msk.f32.gmra.mrb[14].mxu0 %vm118_vm14, %v718_v37  ;;  %506 = vmatmul.mubr.msk.f32.gmra.mrb[14].mxu1 %vm134_vm15, %v718_v37 }
 0x11c   :  { %v539_v7 = vpop.f32.mrb[0].mxu0  ;;  %v563_v8 = vpop.f32.mrb[0].mxu1 }
 0x11d   :  { %v540_v9 = vpop.f32.mrb[1].mxu0  ;;  %v564_v10 = vpop.f32.mrb[1].mxu1 }
 0x11e   :  { %v541_v11 = vadd.f32 %v540_v9, %v539_v7  ;;  %v565_v12 = vadd.f32 %v564_v10, %v563_v8 }
 0x120   :  { %v542_v13 = vpop.f32.mrb[2].mxu0  ;;  %v566_v14 = vpop.f32.mrb[2].mxu1  ;;  %409 = vst [vmem:[#allocation7] sm:$0xff] %v541_v11  ;;  %417 = vst [vmem:[#allocation7 + $0x40] sm:$0xff] %v565_v12 }
 0x121   :  { %v543_v15 = vpop.f32.mrb[3].mxu0  ;;  %v567_v16 = vpop.f32.mrb[3].mxu1 }
 0x122   :  { %v544_v17 = vadd.f32 %v543_v15, %v542_v13  ;;  %v568_v18 = vadd.f32 %v567_v16, %v566_v14 }
 0x124   :  { %v545_v19 = vpop.f32.mrb[4].mxu0  ;;  %v569_v20 = vpop.f32.mrb[4].mxu1  ;;  %410 = vst [vmem:[#allocation7 + $0x8] sm:$0xff] %v544_v17  ;;  %418 = vst [vmem:[#allocation7 + $0x48] sm:$0xff] %v568_v18 }
 0x125   :  { %v546_v21 = vpop.f32.mrb[5].mxu0  ;;  %v570_v22 = vpop.f32.mrb[5].mxu1 }
 0x126   :  { %v547_v23 = vadd.f32 %v546_v21, %v545_v19  ;;  %v571_v24 = vadd.f32 %v570_v22, %v569_v20 }
 0x128   :  { %v548_v25 = vpop.f32.mrb[6].mxu0  ;;  %v572_v26 = vpop.f32.mrb[6].mxu1  ;;  %411 = vst [vmem:[#allocation7 + $0x10] sm:$0xff] %v547_v23  ;;  %419 = vst [vmem:[#allocation7 + $0x50] sm:$0xff] %v571_v24 }
 0x129   :  { %v549_v27 = vpop.f32.mrb[7].mxu0  ;;  %v573_v28 = vpop.f32.mrb[7].mxu1 }
 0x12a   :  { %v550_v29 = vadd.f32 %v549_v27, %v548_v25  ;;  %v574_v30 = vadd.f32 %v573_v28, %v572_v26 }
 0x12c   :  { %v551_v31 = vpop.f32.mrb[8].mxu0  ;;  %v575_v32 = vpop.f32.mrb[8].mxu1  ;;  %412 = vst [vmem:[#allocation7 + $0x18] sm:$0xff] %v550_v29  ;;  %420 = vst [vmem:[#allocation7 + $0x58] sm:$0xff] %v574_v30 }
 0x12d   :  { %v552_v33 = vpop.f32.mrb[9].mxu0  ;;  %v576_v34 = vpop.f32.mrb[9].mxu1 }
 0x12e   :  { %v553_v35 = vadd.f32 %v552_v33, %v551_v31  ;;  %v577_v36 = vadd.f32 %v576_v34, %v575_v32 }
 0x130   :  { %v554_v37 = vpop.f32.mrb[10].mxu0  ;;  %v578_v38 = vpop.f32.mrb[10].mxu1  ;;  %413 = vst [vmem:[#allocation7 + $0x20] sm:$0xff] %v553_v35  ;;  %421 = vst [vmem:[#allocation7 + $0x60] sm:$0xff] %v577_v36 }
 0x131   :  { %v555_v39 = vpop.f32.mrb[11].mxu0  ;;  %v579_v40 = vpop.f32.mrb[11].mxu1 }
 0x132   :  { %v556_v41 = vadd.f32 %v555_v39, %v554_v37  ;;  %v580_v42 = vadd.f32 %v579_v40, %v578_v38 }
 0x134   :  { %v557_v43 = vpop.f32.mrb[12].mxu0  ;;  %v581_v44 = vpop.f32.mrb[12].mxu1  ;;  %414 = vst [vmem:[#allocation7 + $0x28] sm:$0xff] %v556_v41  ;;  %422 = vst [vmem:[#allocation7 + $0x68] sm:$0xff] %v580_v42 }
 0x135   :  { %v558_v45 = vpop.f32.mrb[13].mxu0  ;;  %v582_v46 = vpop.f32.mrb[13].mxu1 }
 0x136   :  { %v559_v47 = vadd.f32 %v558_v45, %v557_v43  ;;  %v583_v48 = vadd.f32 %v582_v46, %v581_v44 }
 0x138   :  { %v560_v49 = vpop.f32.mrb[14].mxu0  ;;  %v584_v50 = vpop.f32.mrb[14].mxu1  ;;  %415 = vst [vmem:[#allocation7 + $0x30] sm:$0xff] %v559_v47  ;;  %423 = vst [vmem:[#allocation7 + $0x70] sm:$0xff] %v583_v48 }
 0x139   :  { %v561_v51 = vpop.f32.mrb[15].mxu0  ;;  %v585_v52 = vpop.f32.mrb[15].mxu1 }
 0x13a   :  { %v562_v53 = vadd.f32 %v561_v51, %v560_v49  ;;  %v586_v54 = vadd.f32 %v585_v52, %v584_v50 }
 0x13c   :  { %416 = vst [vmem:[#allocation7 + $0x38] sm:$0xff] %v562_v53  ;;  %424 = vst [vmem:[#allocation7 + $0x78] sm:$0xff] %v586_v54 }
 0x13d   :  { %697 = shalt.err (!%p694_p6)
}
 0x13e   :  { %s698_s10 = scalar_lea.hbm %s879_s2, 2048 }
 0x13f   :  { %p699_p7 = scmp.ne.s32.totalorder %s879_s2, %s698_s10  ;;  %p702_p8 = scmp.lt.u32.totalorder %s698_s10, %s879_s2 }
 0x141   :  { %p704_p9 = pnand %p702_p8, %p699_p7 }
 0x143   :  { %707 = shalt.err (!%p704_p9)
}
 0x144   :  { %436 = dma.vmem_to_hbm [thread:$0]  %s431_s6, 2048, %s879_s2, [#allocation4], %s716_s0, %s716_s0, %s717_s3  }
 0x145   :  { %712 = dma.done.wait [#allocation4], 2048  }
 0x146   :  { %713 = vsyncadd [#allocation4], 4294965248 }
 0x147   :  { %440 = vsyncpa [#allocation3], 1 }
 0x148   :  { %441 = vsyncpa [#allocation6], 1 }
 0x149   :  { %442 = vsyncpa [#allocation4], 1 }

</bundles_post_ra>
